<compile_context>
chip_gen: v5e
topology: v5e:2x2
jax: 0.10.0
libtpu: 0.0.40
codegen_flags: <defaults>
</compile_context>

<pallas_src>
import jax
import jax.numpy as jnp
from jax.experimental import pallas as pl
from jax.experimental.pallas import tpu as pltpu


def _cubic_relu_kernel(x_ref, o_ref):
    x = x_ref[...]
    y = x * x * x                      # x**3, 2 VPU muls
    o_ref[...] = jnp.maximum(y, 0.0)   # relu; weak-typed 0.0 keeps x's dtype


def cubic_relu(x: jax.Array, *, target_block_bytes: int = 4 << 20) -> jax.Array:
    """Applies relu(x**3) elementwise; accepts any shape (e.g. NCHW)."""
    orig_shape = x.shape
    orig_dtype = x.dtype
    n = x.size
    if n == 0:
        return x

    # Widest lane count (multiple of 128, capped at 2048) dividing n.
    lanes = None
    for w in (2048, 1024, 512, 256, 128):
        if n % w == 0:
            lanes = w
            break

    if lanes is None:
        # Rare ragged case (n not a multiple of 128): minimal flat-tail pad.
        # TODO(synk): handle the <128-element tail with a masked last-lane
        # store instead of materializing a padded copy if this path gets hot.
        lanes = 128
        pad = (-n) % lanes
        x_flat = jnp.pad(jnp.reshape(x, (-1,)), (0, pad))
    else:
        x_flat = jnp.reshape(x, (-1,))          # metadata-only reshape

    rows = x_flat.size // lanes
    x2d = jnp.reshape(x_flat, (rows, lanes))

    itemsize = jnp.dtype(orig_dtype).itemsize
    bytes_per_row = lanes * itemsize
    # Sublane granularity: 8 for 32-bit, 16 for bf16, 32 for 8-bit dtypes.
    sub = max(8, (4 // max(itemsize, 1)) * 8)
    tr = max(sub, (target_block_bytes // bytes_per_row) // sub * sub)
    if tr >= rows:
        tr = rows                                # full array dim: always legal
    grid = (pl.cdiv(rows, tr),)                  # ragged last block is masked

    out2d = pl.pallas_call(
        _cubic_relu_kernel,
        out_shape=jax.ShapeDtypeStruct((rows, lanes), orig_dtype),
        grid_spec=pltpu.PrefetchScalarGridSpec(
            num_scalar_prefetch=0,
            grid=grid,
            in_specs=[pl.BlockSpec((tr, lanes), lambda i: (i, 0))],
            out_specs=pl.BlockSpec((tr, lanes), lambda i: (i, 0)),
        ),
        compiler_params=pltpu.CompilerParams(
            dimension_semantics=("parallel",),
            vmem_limit_bytes=32 << 20),
    )(x2d)

    out_flat = jnp.reshape(out2d, (-1,))
    if out_flat.size != n:                       # only in the padded fallback
        out_flat = out_flat[:n]
    return jnp.reshape(out_flat, orig_shape)


if __name__ == "__main__":
    key = jax.random.PRNGKey(0)
    # NCHW input, matching PyTorch conv-style layout conventions.
    x = jax.random.normal(key, (2, 4, 16, 16), dtype=jnp.float32)

    y = cubic_relu(x)
    y = jax.block_until_ready(y)

    # Reference check against plain JAX semantics of F.relu(x.pow(3)).
    ref = jnp.maximum(x ** 3, 0.0)
    assert y.shape == x.shape and y.dtype == x.dtype
    assert jnp.allclose(y, ref, atol=1e-6, rtol=1e-6)

    print("KERNEL_OK")
</pallas_src>

<mosaic_0001>
module attributes {stable_mosaic.version = 11 : i64} {
  func.func @_cubic_relu_kernel(%arg0: i32, %arg1: memref<1x2048xf32, #tpu.memory_space<vmem>>, %arg2: memref<1x2048xf32, #tpu.memory_space<vmem>>) attributes {dimension_semantics = [#tpu.dimension_semantics<parallel>], iteration_bounds = array<i64: 1>, scalar_prefetch = 0 : i64, scratch_operands = 0 : i64, tpu.core_type = #tpu.core_type<tc>, window_params = [{transform_indices = @transform_0, window_bounds = array<i64: 1, 2048>}, {transform_indices = @transform_1, window_bounds = array<i64: 1, 2048>}]} {
    %c0 = arith.constant 0 : index
    %c0_0 = arith.constant 0 : index
    %0 = vector.load %arg1[%c0, %c0_0] : memref<1x2048xf32, #tpu.memory_space<vmem>>, vector<1x2048xf32>
    %1 = arith.mulf %0, %0 : vector<1x2048xf32>
    %2 = arith.mulf %1, %0 : vector<1x2048xf32>
    %cst = arith.constant 0.000000e+00 : f32
    %3 = vector.broadcast %cst : f32 to vector<1x2048xf32>
    %4 = arith.maximumf %2, %3 : vector<1x2048xf32>
    %c0_1 = arith.constant 0 : index
    %c0_2 = arith.constant 0 : index
    %5 = vector.load %arg2[%c0_1, %c0_2] : memref<1x2048xf32, #tpu.memory_space<vmem>>, vector<1x2048xf32>
    tpu.vector_store %arg2[%c0_1, %c0_2], %4 {strides = array<i32>} : memref<1x2048xf32, #tpu.memory_space<vmem>>, vector<1x2048xf32>,
    return
  }
  func.func @transform_0(%arg0: i32) -> (i32, i32) {
    %c0_i32 = arith.constant 0 : i32
    %c0_i32_0 = arith.constant 0 : i32
    return %arg0, %c0_i32 : i32, i32
  }
  func.func @transform_1(%arg0: i32) -> (i32, i32) {
    %c0_i32 = arith.constant 0 : i32
    %c0_i32_0 = arith.constant 0 : i32
    return %arg0, %c0_i32 : i32, i32
  }
}

</mosaic_0001>

<bundles_post_ra>
// kernel: tpu_custom_call.1
= control target key start
LH: loop header
LB: loop body
LE: loop exit
PB: predicated region body
PF: predicated region fallthrough
CT: control target
= control target key end

     0   :  { %6 = vsyncpa [#allocation3], 0  ;;  %s122_s0 = inlined_call_operand.hbm [shape: f32[1,2048], index: 0, kind: input, shape index: {}]   ;;  %s123_s1 = inlined_call_operand.hbm [shape: f32[1,2048], index: 1, kind: output, shape index: {}]  }
   0x1   :  { %7 = vsyncpa [#allocation4], 0  ;;  %s13_s8 = sshll.u32 %s122_s0, 4  ;;  %s104_s9 = smov [#allocation2]   ;;  %s14_s8 = int_to_ptr.hbm [resolvable:$true] %s13_s8 }
   0x2   :  { %s15_s10 = sshll.u32 %s104_s9, 4  ;;  %s16_s10 = int_to_ptr.vmem [resolvable:$true] %s15_s10 }
   0x3   :  { %18 = dma.hbm_to_vmem [thread:$0]  %s14_s8, 256, %s16_s10, [#allocation3]  }
   0x4   :  { %100 = dma.done.wait [#allocation3], 256  }
   0x5   :  { %101 = vsyncadd [#allocation3], 4294967040  ;;  %v23_v0 = vld [vmem:[#allocation2] sm:$0xff]  ;;  %v24_v1 = vld [vmem:[#allocation2 + $0x8] sm:$0xff]  ;;  %s105_s11 = smov [#allocation5]   ;;  %s40_s15 = sshll.u32 %s123_s1, 4  ;;  %s41_s15 = int_to_ptr.hbm [resolvable:$true] %s40_s15 }
   0x6   :  { %v25_v2 = vmul.f32 %v23_v0, %v23_v0  ;;  %v26_v3 = vmul.f32 %v24_v1, %v24_v1  ;;  %s38_s12 = sshll.u32 %s105_s11, 4  ;;  %s39_s12 = int_to_ptr.vmem [resolvable:$true] %s38_s12 }
   0x8   :  { %v27_v4 = vmul.f32 %v25_v2, %v23_v0  ;;  %v28_v5 = vmul.f32 %v26_v3, %v24_v1 }
   0xa   :  { %v29_v6 = vmax.f32 %v27_v4, 0.0  ;;  %v30_v7 = vmax.f32 %v28_v5, 0.0 }
   0xc   :  { %31 = vst [vmem:[#allocation5] sm:$0xff] %v29_v6 }
   0xd   :  { %32 = vst [vmem:[#allocation5 + $0x8] sm:$0xff] %v30_v7 }
   0xe   :  { %43 = dma.vmem_to_hbm [thread:$0]  %s39_s12, 256, %s41_s15, [#allocation4]  }
   0xf   :  { %102 = dma.done.wait [#allocation4], 256  }
  0x10   :  { %103 = vsyncadd [#allocation4], 4294967040 }
  0x11   :  { %48 = vsyncpa [#allocation3], 1 }
  0x12   :  { %49 = vsyncpa [#allocation4], 1 }

</bundles_post_ra>
